<compile_context>
chip_gen: v6e
topology: v6e:2x2x1
jax: 0.10.0
libtpu: 0.0.40
codegen_flags: <defaults>
</compile_context>

<pallas_src>
import jax
import jax.numpy as jnp
from jax import lax
from jax.experimental import pallas as pl
from jax.experimental.pallas import tpu as pltpu

C_IN = 144
C_OUT = 32
BN_EPS = 1e-3
T_HW = 512                      # spatial (lane) tile; raise to 1024-2048 for large H*W
VMEM_LIMIT = 32 * 1024 * 1024   # explicit scoped-VMEM limit (safe on v5e/v6e/v7x)


def conv_stats_kernel(x_ref, w_ref, y_ref, sum_ref, ssq_ref):
    # x_ref: (1, C_IN, T_HW)    w_ref: (C_OUT, C_IN)  (VMEM-resident across the grid)
    # y_ref: (1, C_OUT, T_HW)   sum_ref / ssq_ref: (1, C_OUT, 1) accumulators
    j = pl.program_id(1)

    y = jnp.dot(w_ref[...], x_ref[0], preferred_element_type=jnp.float32)  # (C_OUT, T_HW)
    y_ref[0] = y

    @pl.when(j == 0)
    def _():
        sum_ref[...] = jnp.zeros_like(sum_ref)
        ssq_ref[...] = jnp.zeros_like(ssq_ref)

    sum_ref[0] += jnp.sum(y, axis=1, keepdims=True)        # (C_OUT, 1)
    ssq_ref[0] += jnp.sum(y * y, axis=1, keepdims=True)    # (C_OUT, 1)


def bn_affine_kernel(y_ref, scale_ref, shift_ref, o_ref):
    # y_ref / o_ref: (1, C_OUT, T_HW); scale_ref / shift_ref: (C_OUT, 1)
    o_ref[0] = y_ref[0] * scale_ref[...] + shift_ref[...]


def _conv2d_bn(x_nchw, w_conv, gamma, beta):
    N, C, H, W = x_nchw.shape
    assert C == C_IN
    HW = H * W
    n_hw = pl.cdiv(HW, T_HW)
    HWp = n_hw * T_HW

    # NCHW -> (N, C_IN, HW); zero-pad the spatial axis to a multiple of T_HW.
    # Padded columns are exactly zero and the conv has no bias, so they contribute
    # nothing to the per-channel sum / sum-of-squares.
    x = x_nchw.reshape(N, C_IN, HW)
    if HWp != HW:
        x = jnp.pad(x, ((0, 0), (0, 0), (0, HWp - HW)))
    w_mat = w_conv.reshape(C_OUT, C_IN)

    y_full, csum, cssq = pl.pallas_call(
        conv_stats_kernel,
        out_shape=(
            jax.ShapeDtypeStruct((N, C_OUT, HWp), jnp.float32),
            jax.ShapeDtypeStruct((N, C_OUT, 1), jnp.float32),
            jax.ShapeDtypeStruct((N, C_OUT, 1), jnp.float32),
        ),
        grid=(N, n_hw),
        in_specs=[
            pl.BlockSpec((1, C_IN, T_HW), lambda n, j: (n, 0, j)),
            pl.BlockSpec((C_OUT, C_IN), lambda n, j: (0, 0)),   # weights stay resident
        ],
        out_specs=(
            pl.BlockSpec((1, C_OUT, T_HW), lambda n, j: (n, 0, j)),
            pl.BlockSpec((1, C_OUT, 1), lambda n, j: (n, 0, 0)),  # accumulator over j
            pl.BlockSpec((1, C_OUT, 1), lambda n, j: (n, 0, 0)),  # accumulator over j
        ),
        compiler_params=pltpu.CompilerParams(
            dimension_semantics=("parallel", "arbitrary"),
            vmem_limit_bytes=VMEM_LIMIT,
        ),
        cost_estimate=pl.CostEstimate(
            flops=2 * N * HWp * C_IN * C_OUT,
            transcendentals=0,
            bytes_accessed=4 * (N * C_IN * HWp + C_IN * C_OUT
                                + N * C_OUT * HWp + 2 * N * C_OUT),
        ),
    )(x, w_mat)

    # Fold batch statistics (over all true N*H*W positions) into a per-channel affine.
    m = jnp.float32(N * HW)                        # true count (padding is exact zeros)
    s = jnp.sum(csum, axis=0)[:, 0]                # (C_OUT,)
    sq = jnp.sum(cssq, axis=0)[:, 0]               # (C_OUT,)
    mean = s / m
    var = jnp.maximum(sq / m - mean * mean, 0.0)   # guard cancellation-induced negatives
    inv_std = lax.rsqrt(var + BN_EPS)
    scale = (gamma * inv_std).reshape(C_OUT, 1)
    shift = (beta - mean * gamma * inv_std).reshape(C_OUT, 1)
    # TODO(synk): BatchNorm2d running_mean/running_var (momentum=0.1) buffers are not
    # updated here; the module's forward output only needs the batch-stat normalization.

    out_full = pl.pallas_call(
        bn_affine_kernel,
        out_shape=jax.ShapeDtypeStruct((N, C_OUT, HWp), jnp.float32),
        grid=(N, n_hw),
        in_specs=[
            pl.BlockSpec((1, C_OUT, T_HW), lambda n, j: (n, 0, j)),
            pl.BlockSpec((C_OUT, 1), lambda n, j: (0, 0)),
            pl.BlockSpec((C_OUT, 1), lambda n, j: (0, 0)),
        ],
        out_specs=pl.BlockSpec((1, C_OUT, T_HW), lambda n, j: (n, 0, j)),
        input_output_aliases={0: 0},               # normalize y in place (no new HBM buf)
        compiler_params=pltpu.CompilerParams(
            dimension_semantics=("parallel", "parallel"),
            vmem_limit_bytes=VMEM_LIMIT,
        ),
        cost_estimate=pl.CostEstimate(
            flops=2 * N * C_OUT * HWp,
            transcendentals=0,
            bytes_accessed=4 * (2 * N * C_OUT * HWp + 2 * C_OUT),
        ),
    )(y_full, scale, shift)

    # Drop the spatial padding (slice + reshape only; still no transposes anywhere).
    return out_full[:, :, :HW].reshape(N, C_OUT, H, W)


conv2d_bn = jax.jit(_conv2d_bn)


if __name__ == "__main__":
    key = jax.random.PRNGKey(0)
    k_x, k_w, k_g, k_b = jax.random.split(key, 4)

    # Shapes implied by the PyTorch module: x49 = randn(1, 144, 28, 28).
    N, H, W = 1, 28, 28
    x = jax.random.normal(k_x, (N, C_IN, H, W), dtype=jnp.float32)
    w_conv = jax.random.normal(k_w, (C_OUT, C_IN, 1, 1), dtype=jnp.float32) * 0.05
    gamma = jnp.ones((C_OUT,), dtype=jnp.float32) + 0.1 * jax.random.normal(k_g, (C_OUT,))
    beta = 0.1 * jax.random.normal(k_b, (C_OUT,), dtype=jnp.float32)

    out = conv2d_bn(x, w_conv, gamma, beta)
    out = jax.block_until_ready(out)

    # Plain-JAX reference: 1x1 conv + training-mode BatchNorm2d (batch statistics).
    y_ref = jnp.einsum("nchw,oc->nohw", x, w_conv.reshape(C_OUT, C_IN))
    mean = jnp.mean(y_ref, axis=(0, 2, 3), keepdims=True)
    var = jnp.mean((y_ref - mean) ** 2, axis=(0, 2, 3), keepdims=True)
    ref = (y_ref - mean) * lax.rsqrt(var + BN_EPS) * gamma.reshape(1, C_OUT, 1, 1) \
        + beta.reshape(1, C_OUT, 1, 1)

    assert out.shape == (N, C_OUT, H, W)
    assert jnp.max(jnp.abs(out - ref)) < 2e-3, float(jnp.max(jnp.abs(out - ref)))

    print("KERNEL_OK")
</pallas_src>

<mosaic_0001>
module attributes {stable_mosaic.version = 11 : i64} {
  func.func @conv_stats_kernel(%arg0: i32, %arg1: i32, %arg2: memref<1x144x512xf32, #tpu.memory_space<vmem>>, %arg3: memref<32x144xf32, #tpu.memory_space<vmem>>, %arg4: memref<1x32x512xf32, #tpu.memory_space<vmem>>, %arg5: memref<1x32x1xf32, #tpu.memory_space<vmem>>, %arg6: memref<1x32x1xf32, #tpu.memory_space<vmem>>) attributes {dimension_semantics = [#tpu.dimension_semantics<parallel>, #tpu.dimension_semantics<arbitrary>], iteration_bounds = array<i64: 1, 2>, scalar_prefetch = 0 : i64, scratch_operands = 0 : i64, tpu.core_type = #tpu.core_type<tc>, window_params = [{transform_indices = @transform_0, window_bounds = array<i64: 1, 144, 512>}, {pipeline_mode = #tpu.pipeline_mode<synchronous>, transform_indices = @transform_1, window_bounds = array<i64: 32, 144>}, {transform_indices = @transform_2, window_bounds = array<i64: 1, 32, 512>}, {transform_indices = @transform_3, window_bounds = array<i64: 1, 32, 1>}, {transform_indices = @transform_4, window_bounds = array<i64: 1, 32, 1>}]} {
    %c0 = arith.constant 0 : index
    %c0_0 = arith.constant 0 : index
    %0 = vector.load %arg3[%c0, %c0_0] : memref<32x144xf32, #tpu.memory_space<vmem>>, vector<32x144xf32>
    %c0_1 = arith.constant 0 : index
    %c0_2 = arith.constant 0 : index
    %c0_3 = arith.constant 0 : index
    %1 = vector.load %arg2[%c0_1, %c0_2, %c0_3] : memref<1x144x512xf32, #tpu.memory_space<vmem>>, vector<1x144x512xf32>
    %2 = vector.shape_cast %1 : vector<1x144x512xf32> to vector<144x512xf32>
    %cst = arith.constant dense<0.000000e+00> : vector<32x512xf32>
    %3 = tpu.matmul %0, %2, %cst {dimension_numbers = #tpu.dot_dimension_numbers<[1], [0], [0], [1], [0, 0, 1, 1], [], []>} : vector<32x144xf32>, vector<144x512xf32>, vector<32x512xf32> -> vector<32x512xf32>
    %c0_4 = arith.constant 0 : index
    %c0_5 = arith.constant 0 : index
    %c0_6 = arith.constant 0 : index
    %4 = vector.load %arg4[%c0_4, %c0_5, %c0_6] : memref<1x32x512xf32, #tpu.memory_space<vmem>>, vector<1x32x512xf32>
    %5 = vector.shape_cast %4 : vector<1x32x512xf32> to vector<32x512xf32>
    %6 = vector.shape_cast %3 : vector<32x512xf32> to vector<1x32x512xf32>
    tpu.vector_store %arg4[%c0_4, %c0_5, %c0_6], %6 {strides = array<i32>} : memref<1x32x512xf32, #tpu.memory_space<vmem>>, vector<1x32x512xf32>,
    %c0_i32 = arith.constant 0 : i32
    %7 = arith.cmpi eq, %arg1, %c0_i32 : i32
    %8 = arith.extui %7 : i1 to i32
    %c0_i32_7 = arith.constant 0 : i32
    %9 = arith.cmpi ne, %8, %c0_i32_7 : i32
    scf.if %9 {
      %cst_22 = arith.constant 0.000000e+00 : f32
      %27 = vector.broadcast %cst_22 : f32 to vector<1x32x1xf32>
      %c0_23 = arith.constant 0 : index
      %c0_24 = arith.constant 0 : index
      %c0_25 = arith.constant 0 : index
      %28 = vector.load %arg5[%c0_23, %c0_24, %c0_25] : memref<1x32x1xf32, #tpu.memory_space<vmem>>, vector<1x32x1xf32>
      tpu.vector_store %arg5[%c0_23, %c0_24, %c0_25], %27 {strides = array<i32>} : memref<1x32x1xf32, #tpu.memory_space<vmem>>, vector<1x32x1xf32>,
      %cst_26 = arith.constant 0.000000e+00 : f32
      %29 = vector.broadcast %cst_26 : f32 to vector<1x32x1xf32>
      %c0_27 = arith.constant 0 : index
      %c0_28 = arith.constant 0 : index
      %c0_29 = arith.constant 0 : index
      %30 = vector.load %arg6[%c0_27, %c0_28, %c0_29] : memref<1x32x1xf32, #tpu.memory_space<vmem>>, vector<1x32x1xf32>
      tpu.vector_store %arg6[%c0_27, %c0_28, %c0_29], %29 {strides = array<i32>} : memref<1x32x1xf32, #tpu.memory_space<vmem>>, vector<1x32x1xf32>,
    } else {
    }
    %c0_8 = arith.constant 0 : index
    %c0_9 = arith.constant 0 : index
    %c0_10 = arith.constant 0 : index
    %10 = vector.load %arg5[%c0_8, %c0_9, %c0_10] : memref<1x32x1xf32, #tpu.memory_space<vmem>>, vector<1x32x1xf32>
    %11 = vector.shape_cast %10 : vector<1x32x1xf32> to vector<32x1xf32>
    %cst_11 = arith.constant dense<0.000000e+00> : vector<32xf32>
    %12 = vector.multi_reduction <add>, %3, %cst_11 [1] : vector<32x512xf32> to vector<32xf32>
    %13 = vector.shape_cast %12 : vector<32xf32> to vector<32x1xf32>
    %14 = arith.addf %11, %13 : vector<32x1xf32>
    %c0_12 = arith.constant 0 : index
    %c0_13 = arith.constant 0 : index
    %c0_14 = arith.constant 0 : index
    %15 = vector.load %arg5[%c0_12, %c0_13, %c0_14] : memref<1x32x1xf32, #tpu.memory_space<vmem>>, vector<1x32x1xf32>
    %16 = vector.shape_cast %15 : vector<1x32x1xf32> to vector<32x1xf32>
    %17 = vector.shape_cast %14 : vector<32x1xf32> to vector<1x32x1xf32>
    tpu.vector_store %arg5[%c0_12, %c0_13, %c0_14], %17 {strides = array<i32>} : memref<1x32x1xf32, #tpu.memory_space<vmem>>, vector<1x32x1xf32>,
    %c0_15 = arith.constant 0 : index
    %c0_16 = arith.constant 0 : index
    %c0_17 = arith.constant 0 : index
    %18 = vector.load %arg6[%c0_15, %c0_16, %c0_17] : memref<1x32x1xf32, #tpu.memory_space<vmem>>, vector<1x32x1xf32>
    %19 = vector.shape_cast %18 : vector<1x32x1xf32> to vector<32x1xf32>
    %20 = arith.mulf %3, %3 : vector<32x512xf32>
    %cst_18 = arith.constant dense<0.000000e+00> : vector<32xf32>
    %21 = vector.multi_reduction <add>, %20, %cst_18 [1] : vector<32x512xf32> to vector<32xf32>
    %22 = vector.shape_cast %21 : vector<32xf32> to vector<32x1xf32>
    %23 = arith.addf %19, %22 : vector<32x1xf32>
    %c0_19 = arith.constant 0 : index
    %c0_20 = arith.constant 0 : index
    %c0_21 = arith.constant 0 : index
    %24 = vector.load %arg6[%c0_19, %c0_20, %c0_21] : memref<1x32x1xf32, #tpu.memory_space<vmem>>, vector<1x32x1xf32>
    %25 = vector.shape_cast %24 : vector<1x32x1xf32> to vector<32x1xf32>
    %26 = vector.shape_cast %23 : vector<32x1xf32> to vector<1x32x1xf32>
    tpu.vector_store %arg6[%c0_19, %c0_20, %c0_21], %26 {strides = array<i32>} : memref<1x32x1xf32, #tpu.memory_space<vmem>>, vector<1x32x1xf32>,
    return
  }
  func.func @transform_0(%arg0: i32, %arg1: i32) -> (i32, i32, i32) {
    %c0_i32 = arith.constant 0 : i32
    %c0_i32_0 = arith.constant 0 : i32
    return %arg0, %c0_i32, %arg1 : i32, i32, i32
  }
  func.func @transform_1(%arg0: i32, %arg1: i32) -> (i32, i32) {
    %c0_i32 = arith.constant 0 : i32
    %c0_i32_0 = arith.constant 0 : i32
    %c0_i32_1 = arith.constant 0 : i32
    return %c0_i32, %c0_i32_0 : i32, i32
  }
  func.func @transform_2(%arg0: i32, %arg1: i32) -> (i32, i32, i32) {
    %c0_i32 = arith.constant 0 : i32
    %c0_i32_0 = arith.constant 0 : i32
    return %arg0, %c0_i32, %arg1 : i32, i32, i32
  }
  func.func @transform_3(%arg0: i32, %arg1: i32) -> (i32, i32, i32) {
    %c0_i32 = arith.constant 0 : i32
    %c0_i32_0 = arith.constant 0 : i32
    %c0_i32_1 = arith.constant 0 : i32
    return %arg0, %c0_i32, %c0_i32_0 : i32, i32, i32
  }
  func.func @transform_4(%arg0: i32, %arg1: i32) -> (i32, i32, i32) {
    %c0_i32 = arith.constant 0 : i32
    %c0_i32_0 = arith.constant 0 : i32
    %c0_i32_1 = arith.constant 0 : i32
    return %arg0, %c0_i32, %c0_i32_0 : i32, i32, i32
  }
}

module attributes {stable_mosaic.version = 11 : i64} {
  func.func @bn_affine_kernel(%arg0: i32, %arg1: i32, %arg2: memref<1x32x512xf32, #tpu.memory_space<vmem>>, %arg3: memref<32x1xf32, #tpu.memory_space<vmem>>, %arg4: memref<32x1xf32, #tpu.memory_space<vmem>>, %arg5: memref<1x32x512xf32, #tpu.memory_space<vmem>>) attributes {dimension_semantics = [#tpu.dimension_semantics<parallel>, #tpu.dimension_semantics<parallel>], iteration_bounds = array<i64: 1, 2>, scalar_prefetch = 0 : i64, scratch_operands = 0 : i64, tpu.core_type = #tpu.core_type<tc>, window_params = [{transform_indices = @transform_0, window_bounds = array<i64: 1, 32, 512>}, {pipeline_mode = #tpu.pipeline_mode<synchronous>, transform_indices = @transform_1, window_bounds = array<i64: 32, 1>}, {pipeline_mode = #tpu.pipeline_mode<synchronous>, transform_indices = @transform_2, window_bounds = array<i64: 32, 1>}, {transform_indices = @transform_3, window_bounds = array<i64: 1, 32, 512>}]} {
    %c0 = arith.constant 0 : index
    %c0_0 = arith.constant 0 : index
    %c0_1 = arith.constant 0 : index
    %0 = vector.load %arg2[%c0, %c0_0, %c0_1] : memref<1x32x512xf32, #tpu.memory_space<vmem>>, vector<1x32x512xf32>
    %1 = vector.shape_cast %0 : vector<1x32x512xf32> to vector<32x512xf32>
    %c0_2 = arith.constant 0 : index
    %c0_3 = arith.constant 0 : index
    %2 = vector.load %arg3[%c0_2, %c0_3] : memref<32x1xf32, #tpu.memory_space<vmem>>, vector<32x1xf32>
    %3 = vector.broadcast %2 : vector<32x1xf32> to vector<32x512xf32>
    %4 = arith.mulf %1, %3 : vector<32x512xf32>
    %c0_4 = arith.constant 0 : index
    %c0_5 = arith.constant 0 : index
    %5 = vector.load %arg4[%c0_4, %c0_5] : memref<32x1xf32, #tpu.memory_space<vmem>>, vector<32x1xf32>
    %6 = vector.broadcast %5 : vector<32x1xf32> to vector<32x512xf32>
    %7 = arith.addf %4, %6 : vector<32x512xf32>
    %c0_6 = arith.constant 0 : index
    %c0_7 = arith.constant 0 : index
    %c0_8 = arith.constant 0 : index
    %8 = vector.load %arg5[%c0_6, %c0_7, %c0_8] : memref<1x32x512xf32, #tpu.memory_space<vmem>>, vector<1x32x512xf32>
    %9 = vector.shape_cast %8 : vector<1x32x512xf32> to vector<32x512xf32>
    %10 = vector.shape_cast %7 : vector<32x512xf32> to vector<1x32x512xf32>
    tpu.vector_store %arg5[%c0_6, %c0_7, %c0_8], %10 {strides = array<i32>} : memref<1x32x512xf32, #tpu.memory_space<vmem>>, vector<1x32x512xf32>,
    return
  }
  func.func @transform_0(%arg0: i32, %arg1: i32) -> (i32, i32, i32) {
    %c0_i32 = arith.constant 0 : i32
    %c0_i32_0 = arith.constant 0 : i32
    return %arg0, %c0_i32, %arg1 : i32, i32, i32
  }
  func.func @transform_1(%arg0: i32, %arg1: i32) -> (i32, i32) {
    %c0_i32 = arith.constant 0 : i32
    %c0_i32_0 = arith.constant 0 : i32
    %c0_i32_1 = arith.constant 0 : i32
    return %c0_i32, %c0_i32_0 : i32, i32
  }
  func.func @transform_2(%arg0: i32, %arg1: i32) -> (i32, i32) {
    %c0_i32 = arith.constant 0 : i32
    %c0_i32_0 = arith.constant 0 : i32
    %c0_i32_1 = arith.constant 0 : i32
    return %c0_i32, %c0_i32_0 : i32, i32
  }
  func.func @transform_3(%arg0: i32, %arg1: i32) -> (i32, i32, i32) {
    %c0_i32 = arith.constant 0 : i32
    %c0_i32_0 = arith.constant 0 : i32
    return %arg0, %c0_i32, %arg1 : i32, i32, i32
  }
}

</mosaic_0001>

<bundles_post_ra>
// kernel: _conv2d_bn.3
= control target key start
LH: loop header
LB: loop body
LE: loop exit
PB: predicated region body
PF: predicated region fallthrough
CT: control target
= control target key end

     0   :  { %s598_s12 = smov 0   ;;  %s600_s13 = smov 0   ;;  %s768_s0 = inlined_call_operand.vmem [shape: f32[1,32,1024], index: 0, kind: input, shape index: {}, may-alias: {0,3}]   ;;  %s769_s1 = inlined_call_operand.vmem [shape: f32[32,1], index: 1, kind: input, shape index: {}]   ;;  %s770_s2 = inlined_call_operand.vmem [shape: f32[32,1], index: 2, kind: input, shape index: {}]   ;;  %s771_s3 = inlined_call_operand.vmem [shape: f32[1,32,1024], index: 3, kind: output, shape index: {}, may-alias: {0,3}]  }
   0x1   :  { %s602_s14 = smov 0   ;;  %s604_s15 = smov 0  }
   0x2   :  { %s606_s16 = smov 0  }
   0x3 LB: > { %s22_s17 = sadd.s32 1, %s571_s15  ;;  %s477_s18 = sadd.s32 4294967295, %s575_s16   ;;  %s575_s16 = sphi %s606_s16, %s13_s16   ;;  %s571_s15 = sphi %s604_s15, %s776_s15   ;;  %s567_s14 = sphi %s602_s14, %s775_s14   ;;  %s563_s13 = sphi %s600_s13, %s774_s13   ;;  %s559_s12 = sphi %s598_s12, %s773_s12  }
   0x4   : > { %p23_p0 = scmp.ge.s32.totalorder %s22_s17, 2  ;;  %p41_p1 = scmp.ne.s32.totalorder %s563_s13, %s559_s12 }
   0x5   : > { %p42_p2 = scmp.eq.s32.totalorder %s575_s16, 0  ;;  %p115_p4 = scmp.eq.s32.totalorder %s477_s18, 1 }
   0x6   : > { %s778_s17 = smov (%p23_p0, %s22_s17), 0  ;;  %s34_s20 = sadd.s32 1, %s563_s13 }
   0x7   : > { %p43_p3 = por %p42_p2, %p41_p1  ;;  %s30_s19 = ssub.s32 %s571_s15, %s778_s17 }
   0x8   : > { %p32_p5 = scmp.eq.s32.totalorder %s30_s19, 0  ;;  %p633_p6 = por %p115_p4, %p41_p1 }
   0x9   : > { %p480_p7 = scmp.ge.s32.totalorder %s575_s16, 2 }
   0xa   : > { %s638_s22 = scalar_select %p32_p5, %s563_s13, %s34_s20  }
   0xb   : > { %143 = sbr.rel (%p480_p7) target bundleno = 28 (0x1c), region = 24 }
  0x10   : > { %146 = sbr.rel (!%p43_p3) target bundleno = 28 (0x1c), region = 28  ;;  %s148_s23 = sand.u32 (%p43_p3), 1, %s563_s13  }
  0x11   : > { %s492_s24 = sshll.u32 (%p43_p3), %s571_s15, 5  ;;  %s481_s25 = sshll.u32 (%p43_p3), %s148_s23, 7 }
  0x12   : > { %s646_s28 = scalar_lea.vmem (%p43_p3), %s768_s0, %s492_s24  ;;  %s150_s29 = scalar_lea.vmem (%p43_p3), [#allocation2], %s481_s25 }
  0x13   : > { %v168_v0 = vld [vmem:[%s646_s28] sm:$0xff] (%p43_p3)  ;;  %v170_v1 = vld [vmem:[%s646_s28 + $0x8] sm:$0xff] (%p43_p3)  ;;  %v172_v2 = vld [vmem:[%s646_s28 + $0x10] sm:$0xff] (%p43_p3) }
  0x14   : > { %169 = vst [vmem:[%s150_s29] sm:$0xff] (%p43_p3), %v168_v0  ;;  %171 = vst [vmem:[%s150_s29 + $0x8] sm:$0xff] (%p43_p3), %v170_v1  ;;  %v174_v3 = vld [vmem:[%s646_s28 + $0x18] sm:$0xff] (%p43_p3)  ;;  %v176_v4 = vld [vmem:[%s646_s28 + $0x40] sm:$0xff] (%p43_p3) }
  0x15   : > { %173 = vst [vmem:[%s150_s29 + $0x10] sm:$0xff] %v172_v2  ;;  %v178_v5 = vld [vmem:[%s646_s28 + $0x48] sm:$0xff]  ;;  %175 = vst [vmem:[%s150_s29 + $0x18] sm:$0xff] %v174_v3  ;;  %v180_v6 = vld [vmem:[%s646_s28 + $0x50] sm:$0xff] }
  0x16   : > { %177 = vst [vmem:[%s150_s29 + $0x20] sm:$0xff] %v176_v4  ;;  %179 = vst [vmem:[%s150_s29 + $0x28] sm:$0xff] %v178_v5  ;;  %v182_v7 = vld [vmem:[%s646_s28 + $0x58] sm:$0xff]  ;;  %v184_v8 = vld [vmem:[%s646_s28 + $0x80] sm:$0xff] }
  0x17   : > { %181 = vst [vmem:[%s150_s29 + $0x30] sm:$0xff] %v180_v6  ;;  %183 = vst [vmem:[%s150_s29 + $0x38] sm:$0xff] %v182_v7  ;;  %v186_v9 = vld [vmem:[%s646_s28 + $0x88] sm:$0xff]  ;;  %v188_v10 = vld [vmem:[%s646_s28 + $0x90] sm:$0xff] }
  0x18   : > { %185 = vst [vmem:[%s150_s29 + $0x40] sm:$0xff] %v184_v8  ;;  %v190_v11 = vld [vmem:[%s646_s28 + $0x98] sm:$0xff]  ;;  %187 = vst [vmem:[%s150_s29 + $0x48] sm:$0xff] %v186_v9  ;;  %v192_v12 = vld [vmem:[%s646_s28 + $0xc0] sm:$0xff] }
  0x19   : > { %189 = vst [vmem:[%s150_s29 + $0x50] sm:$0xff] %v188_v10  ;;  %191 = vst [vmem:[%s150_s29 + $0x58] sm:$0xff] %v190_v11  ;;  %v194_v13 = vld [vmem:[%s646_s28 + $0xc8] sm:$0xff]  ;;  %v196_v14 = vld [vmem:[%s646_s28 + $0xd0] sm:$0xff] }
  0x1a   : > { %193 = vst [vmem:[%s150_s29 + $0x60] sm:$0xff] %v192_v12  ;;  %195 = vst [vmem:[%s150_s29 + $0x68] sm:$0xff] %v194_v13  ;;  %v198_v15 = vld [vmem:[%s646_s28 + $0xd8] sm:$0xff] }
  0x1b   : > { %197 = vst [vmem:[%s150_s29 + $0x70] sm:$0xff] %v196_v14  ;;  %199 = vst [vmem:[%s150_s29 + $0x78] sm:$0xff] %v198_v15 }
  0x1c PF: > { %p484_p8 = scmp.ge.s32.totalorder %s575_s16, 1  ;;  %p204_p9 = scmp.lt.s32.totalorder %s575_s16, 3 }
  0x1e   : > { %p205_p10 = pnand %p484_p8, %p204_p9 }
  0x1f   : > { %s211_s27 = sand.u32 (!%p205_p10), 1, %s559_s12  }
  0x20   : > { %208 = sbr.rel (%p205_p10) target bundleno = 189 (0xbd), region = 51  ;;  %s691_s28 = sshll.u32 (!%p205_p10), %s211_s27, 7 }
  0x21   : > { %s694_s29 = scalar_lea.vmem (!%p205_p10), [#allocation2], %s691_s28  ;;  %s713_s12 = scalar_lea.vmem (!%p205_p10), [#allocation3], %s691_s28 }
  0x25   : > { %v253_v16 = vld [vmem:[%s769_s1 + $0x10] sm:$0xff]  ;;  %v251_v17 = vld [vmem:[%s769_s1] sm:$0xff]  ;;  %v577_v18 = vmov 0   ;;  %v254_v19 = vld [vmem:[%s769_s1 + $0x18] sm:$0xff]  ;;  %s493_s30 = sshll.u32 (%p633_p6), %s567_s14, 5 }
  0x26   : > { %536 = vset.pattern.permute.xlu1 %v577_v18  ;;  %535 = vset.pattern.permute.xlu0 %v577_v18  ;;  %v252_v20 = vld [vmem:[%s769_s1 + $0x8] sm:$0xff]  ;;  %v291_v22 = vld [vmem:[%s770_s2] sm:$0xff]  ;;  %v294_v23 = vld [vmem:[%s770_s2 + $0x18] sm:$0xff]  ;;  %s358_s6 = scalar_lea.vmem (%p633_p6), %s771_s3, %s493_s30 }
  0x27   : > { %267 = vperm.xlu1 %536, %v253_v16   ;;  %257 = vperm.xlu0 %535, %v251_v17   ;;  %v292_v21 = vld [vmem:[%s770_s2 + $0x8] sm:$0xff]  ;;  %v293_v24 = vld [vmem:[%s770_s2 + $0x10] sm:$0xff]  ;;  %v235_v27 = vld [vmem:[%s694_s29] sm:$0xff] }
  0x28   : > { %v239_v28 = vld [vmem:[%s694_s29 + $0x20] sm:$0xff]  ;;  %v240_v31 = vld [vmem:[%s694_s29 + $0x28] sm:$0xff]  ;;  %v241_v32 = vld [vmem:[%s694_s29 + $0x30] sm:$0xff] }
  0x29   : > { %v242_v33 = vld [vmem:[%s694_s29 + $0x38] sm:$0xff]  ;;  %v236_v34 = vld [vmem:[%s694_s29 + $0x8] sm:$0xff]  ;;  %v237_v35 = vld [vmem:[%s694_s29 + $0x10] sm:$0xff] }
  0x2a   : > { %v238_v36 = vld [vmem:[%s694_s29 + $0x18] sm:$0xff]  ;;  %v247_v41 = vld [vmem:[%s694_s29 + $0x60] sm:$0xff]  ;;  %v248_v42 = vld [vmem:[%s694_s29 + $0x68] sm:$0xff] }
  0x2b   : > { %272 = vperm.xlu1 %536, %v254_v19   ;;  %262 = vperm.xlu0 %535, %v252_v20   ;;  %v249_v49 = vld [vmem:[%s694_s29 + $0x70] sm:$0xff]  ;;  %v250_v50 = vld [vmem:[%s694_s29 + $0x78] sm:$0xff]  ;;  %v243_v51 = vld [vmem:[%s694_s29 + $0x40] sm:$0xff] }
  0x2c   : > { %v244_v56 = vld [vmem:[%s694_s29 + $0x48] sm:$0xff]  ;;  %v245_v57 = vld [vmem:[%s694_s29 + $0x50] sm:$0xff]  ;;  %v246_v58 = vld [vmem:[%s694_s29 + $0x58] sm:$0xff] }
  0x2f   : > { %302 = vperm.xlu1 %536, %v292_v21   ;;  %297 = vperm.xlu0 %535, %v291_v22  }
  0x33   : > { %312 = vperm.xlu1 %536, %v294_v23   ;;  %307 = vperm.xlu0 %535, %v293_v24  }
  0xa2   : > { %v268_v25 = vpop.permute.xlu1 %267  ;;  %v258_v26 = vpop.permute.xlu0 %257 }
  0xa3   : > { %v275_v43 = vmul.f32 %v258_v26, %v235_v27  ;;  %v276_v44 = vmul.f32 %v258_v26, %v236_v34  ;;  %v277_v45 = vmul.f32 %v258_v26, %v237_v35  ;;  %v278_v46 = vmul.f32 %v258_v26, %v238_v36 }
  0xa4   : > { %v283_v5 = vmul.f32 %v268_v25, %v243_v51  ;;  %v284_v6 = vmul.f32 %v268_v25, %v244_v56  ;;  %v285_v7 = vmul.f32 %v268_v25, %v245_v57  ;;  %v286_v8 = vmul.f32 %v268_v25, %v246_v58 }
  0xa6   : > { %v273_v29 = vpop.permute.xlu1 %272  ;;  %v263_v30 = vpop.permute.xlu0 %262 }
  0xa7   : > { %v279_v37 = vmul.f32 %v263_v30, %v239_v28  ;;  %v280_v38 = vmul.f32 %v263_v30, %v240_v31  ;;  %v281_v39 = vmul.f32 %v263_v30, %v241_v32  ;;  %v282_v40 = vmul.f32 %v263_v30, %v242_v33 }
  0xa8   : > { %v287_v63 = vmul.f32 %v273_v29, %v247_v41  ;;  %v288_v0 = vmul.f32 %v273_v29, %v248_v42  ;;  %v289_v1 = vmul.f32 %v273_v29, %v249_v49  ;;  %v290_v2 = vmul.f32 %v273_v29, %v250_v50 }
  0xaa   : > { %v303_v47 = vpop.permute.xlu1 %302  ;;  %v298_v48 = vpop.permute.xlu0 %297 }
  0xab   : > { %v319_v52 = vadd.f32 %v303_v47, %v279_v37  ;;  %v320_v53 = vadd.f32 %v303_v47, %v280_v38  ;;  %v321_v54 = vadd.f32 %v303_v47, %v281_v39  ;;  %v322_v55 = vadd.f32 %v303_v47, %v282_v40 }
  0xac   : > { %v315_v59 = vadd.f32 %v298_v48, %v275_v43  ;;  %v316_v60 = vadd.f32 %v298_v48, %v276_v44  ;;  %v317_v61 = vadd.f32 %v298_v48, %v277_v45  ;;  %v318_v62 = vadd.f32 %v298_v48, %v278_v46 }
  0xad   : > { %335 = vst [vmem:[%s713_s12 + $0x20] sm:$0xff] %v319_v52  ;;  %336 = vst [vmem:[%s713_s12 + $0x28] sm:$0xff] %v320_v53 }
  0xae   : > { %337 = vst [vmem:[%s713_s12 + $0x30] sm:$0xff] %v321_v54  ;;  %338 = vst [vmem:[%s713_s12 + $0x38] sm:$0xff] %v322_v55  ;;  %v313_v3 = vpop.permute.xlu1 %312  ;;  %v308_v4 = vpop.permute.xlu0 %307 }
  0xaf   : > { %331 = vst [vmem:[%s713_s12] sm:$0xff] %v315_v59  ;;  %332 = vst [vmem:[%s713_s12 + $0x8] sm:$0xff] %v316_v60  ;;  %v327_v9 = vadd.f32 %v313_v3, %v287_v63  ;;  %v328_v10 = vadd.f32 %v313_v3, %v288_v0  ;;  %v329_v11 = vadd.f32 %v313_v3, %v289_v1 }
  0xb0   : > { %333 = vst [vmem:[%s713_s12 + $0x10] sm:$0xff] %v317_v61  ;;  %334 = vst [vmem:[%s713_s12 + $0x18] sm:$0xff] %v318_v62  ;;  %v330_v12 = vadd.f32 %v313_v3, %v290_v2  ;;  %v323_v13 = vadd.f32 %v308_v4, %v283_v5  ;;  %v324_v14 = vadd.f32 %v308_v4, %v284_v6  ;;  %353 = sbr.rel (!%p633_p6) target bundleno = 189 (0xbd), region = 59 }
  0xb1   : > { %v325_v15 = vadd.f32 %v308_v4, %v285_v7  ;;  %v326_v16 = vadd.f32 %v308_v4, %v286_v8  ;;  %343 = vst [vmem:[%s713_s12 + $0x60] sm:$0xff] %v327_v9  ;;  %344 = vst [vmem:[%s713_s12 + $0x68] sm:$0xff] %v328_v10 }
  0xb2   : > { %345 = vst [vmem:[%s713_s12 + $0x70] sm:$0xff] %v329_v11  ;;  %346 = vst [vmem:[%s713_s12 + $0x78] sm:$0xff] %v330_v12 }
  0xb3   : > { %339 = vst [vmem:[%s713_s12 + $0x40] sm:$0xff] %v323_v13  ;;  %340 = vst [vmem:[%s713_s12 + $0x48] sm:$0xff] %v324_v14 }
  0xb4   : > { %341 = vst [vmem:[%s713_s12 + $0x50] sm:$0xff] %v325_v15  ;;  %342 = vst [vmem:[%s713_s12 + $0x58] sm:$0xff] %v326_v16  ;;  %v379_v21 = vld [vmem:[%s713_s12 + $0x20] sm:$0xff] (%p633_p6)  ;;  %v381_v22 = vld [vmem:[%s713_s12 + $0x28] sm:$0xff] (%p633_p6) }
  0xb5   : > { %380 = vst [vmem:[%s358_s6 + $0x40] sm:$0xff] %v379_v21  ;;  %382 = vst [vmem:[%s358_s6 + $0x48] sm:$0xff] %v381_v22  ;;  %v383_v23 = vld [vmem:[%s713_s12 + $0x30] sm:$0xff]  ;;  %v385_v24 = vld [vmem:[%s713_s12 + $0x38] sm:$0xff] }
  0xb6   : > { %v371_v17 = vld [vmem:[%s713_s12] sm:$0xff]  ;;  %v373_v18 = vld [vmem:[%s713_s12 + $0x8] sm:$0xff]  ;;  %384 = vst [vmem:[%s358_s6 + $0x50] sm:$0xff] %v383_v23  ;;  %386 = vst [vmem:[%s358_s6 + $0x58] sm:$0xff] %v385_v24 }
  0xb7   : > { %v375_v19 = vld [vmem:[%s713_s12 + $0x10] sm:$0xff]  ;;  %v377_v20 = vld [vmem:[%s713_s12 + $0x18] sm:$0xff]  ;;  %372 = vst [vmem:[%s358_s6] sm:$0xff] %v371_v17  ;;  %374 = vst [vmem:[%s358_s6 + $0x8] sm:$0xff] %v373_v18 }
  0xb8   : > { %376 = vst [vmem:[%s358_s6 + $0x10] sm:$0xff] %v375_v19  ;;  %378 = vst [vmem:[%s358_s6 + $0x18] sm:$0xff] %v377_v20  ;;  %v395_v29 = vld [vmem:[%s713_s12 + $0x60] sm:$0xff]  ;;  %v397_v30 = vld [vmem:[%s713_s12 + $0x68] sm:$0xff] }
  0xb9   : > { %v399_v31 = vld [vmem:[%s713_s12 + $0x70] sm:$0xff]  ;;  %396 = vst [vmem:[%s358_s6 + $0xc0] sm:$0xff] %v395_v29  ;;  %398 = vst [vmem:[%s358_s6 + $0xc8] sm:$0xff] %v397_v30  ;;  %v401_v32 = vld [vmem:[%s713_s12 + $0x78] sm:$0xff] }
  0xba   : > { %v387_v25 = vld [vmem:[%s713_s12 + $0x40] sm:$0xff]  ;;  %v389_v26 = vld [vmem:[%s713_s12 + $0x48] sm:$0xff]  ;;  %400 = vst [vmem:[%s358_s6 + $0xd0] sm:$0xff] %v399_v31  ;;  %402 = vst [vmem:[%s358_s6 + $0xd8] sm:$0xff] %v401_v32 }
  0xbb   : > { %388 = vst [vmem:[%s358_s6 + $0x80] sm:$0xff] %v387_v25  ;;  %v391_v27 = vld [vmem:[%s713_s12 + $0x50] sm:$0xff]  ;;  %v393_v28 = vld [vmem:[%s713_s12 + $0x58] sm:$0xff]  ;;  %390 = vst [vmem:[%s358_s6 + $0x88] sm:$0xff] %v389_v26 }
  0xbc   : > { %392 = vst [vmem:[%s358_s6 + $0x90] sm:$0xff] %v391_v27  ;;  %394 = vst [vmem:[%s358_s6 + $0x98] sm:$0xff] %v393_v28 }
  0xbd PF: > { %s13_s16 = sadd.s32 1, %s575_s16   ;;  %s773_s12 = smov %s563_s13 }
  0xbe   : > { %p10_p11 = scmp.ge.s32.totalorder %s13_s16, 4   ;;  %s774_s13 = smov %s638_s22 }
  0xbf   : > { %s775_s14 = smov %s571_s15  ;;  %s776_s15 = smov %s778_s17 }
  0xc0   :  { %12 = sbr.rel (!%p10_p11) target bundleno = 3 (0x3), region = 113 }

// kernel: _conv2d_bn.2
= control target key start
LH: loop header
LB: loop body
LE: loop exit
PB: predicated region body
PF: predicated region fallthrough
CT: control target
= control target key end

     0   :  { %s1105_s15 = smov 0   ;;  %s1107_s16 = smov 0   ;;  %s1562_s0 = inlined_call_operand.vmem [shape: f32[1,144,1024], index: 0, kind: input, shape index: {}]   ;;  %s1563_s1 = inlined_call_operand.vmem [shape: f32[32,144], index: 1, kind: input, shape index: {}]   ;;  %s1564_s2 = inlined_call_operand.vmem [shape: f32[1,32,1024], index: 2, kind: output, shape index: {0}]   ;;  %s1565_s3 = inlined_call_operand.vmem [shape: f32[1,32,1], index: 3, kind: output, shape index: {1}]   ;;  %s1566_s4 = inlined_call_operand.vmem [shape: f32[1,32,1], index: 4, kind: output, shape index: {2}]  }
   0x1   :  { %s1109_s17 = smov 0   ;;  %s1111_s18 = smov 0  }
   0x2   :  { %s1113_s19 = smov 0  }
   0x3 LB: > { %s24_s20 = sadd.s32 1, %s1073_s18  ;;  %s970_s21 = sadd.s32 4294967295, %s1077_s19   ;;  %s1077_s19 = sphi %s1113_s19, %s15_s19   ;;  %s1073_s18 = sphi %s1111_s18, %s1571_s18   ;;  %s1069_s17 = sphi %s1109_s17, %s1570_s17   ;;  %s1065_s16 = sphi %s1107_s16, %s1569_s16   ;;  %s1061_s15 = sphi %s1105_s15, %s1568_s15  }
   0x4   : > { %p25_p0 = scmp.ge.s32.totalorder %s24_s20, 2  ;;  %p43_p1 = scmp.ne.s32.totalorder %s1065_s16, %s1061_s15 }
   0x5   : > { %p44_p2 = scmp.eq.s32.totalorder %s1077_s19, 0  ;;  %p96_p4 = scmp.eq.s32.totalorder %s970_s21, 1 }
   0x6   : > { %s1573_s20 = smov (%p25_p0, %s24_s20), 0  ;;  %s36_s23 = sadd.s32 1, %s1065_s16 }
   0x7   : > { %p45_p3 = por %p44_p2, %p43_p1  ;;  %s32_s22 = ssub.s32 %s1073_s18, %s1573_s20 }
   0x8   : > { %p34_p5 = scmp.eq.s32.totalorder %s32_s22, 0  ;;  %p1140_p6 = por %p96_p4, %p43_p1 }
   0x9   : > { %p973_p7 = scmp.ge.s32.totalorder %s1077_s19, 2 }
   0xa   : > { %s1145_s25 = scalar_select %p34_p5, %s1065_s16, %s36_s23  }
   0xb   : > { %173 = sbr.rel (%p973_p7) target bundleno = 57 (0x39), region = 20 }
  0x10   : > { %176 = sbr.rel (!%p45_p3) target bundleno = 57 (0x39), region = 24  ;;  %s178_s26 = sand.u32 (%p45_p3), 1, %s1065_s16  }
  0x11   : > { %s994_s27 = sshll.u32 (%p45_p3), %s1073_s18, 5  ;;  %s996_s28 = smul.u32 (%p45_p3), 576, %s178_s26 }
  0x12   : > { %s1153_s5 = scalar_lea.vmem (%p45_p3), %s1562_s0, %s994_s27 }
  0x13   : > { %v198_v0 = vld [vmem:[%s1153_s5] sm:$0xff] (%p45_p3)  ;;  %v200_v1 = vld [vmem:[%s1153_s5 + $0x8] sm:$0xff] (%p45_p3)  ;;  %v202_v2 = vld [vmem:[%s1153_s5 + $0x10] sm:$0xff] (%p45_p3)  ;;  %s1161_s6 = scalar_lea.vmem (%p45_p3), [#allocation2], %s996_s28 }
  0x14   : > { %v204_v3 = vld [vmem:[%s1153_s5 + $0x18] sm:$0xff] (%p45_p3)  ;;  %v206_v4 = vld [vmem:[%s1153_s5 + $0x40] sm:$0xff] (%p45_p3)  ;;  %v208_v5 = vld [vmem:[%s1153_s5 + $0x48] sm:$0xff] (%p45_p3)  ;;  %199 = vst [vmem:[%s1161_s6] sm:$0xff] (%p45_p3), %v198_v0 }
  0x15   : > { %201 = vst [vmem:[%s1161_s6 + $0x8] sm:$0xff] %v200_v1  ;;  %203 = vst [vmem:[%s1161_s6 + $0x10] sm:$0xff] %v202_v2  ;;  %v210_v6 = vld [vmem:[%s1153_s5 + $0x50] sm:$0xff]  ;;  %v212_v7 = vld [vmem:[%s1153_s5 + $0x58] sm:$0xff] }
  0x16   : > { %205 = vst [vmem:[%s1161_s6 + $0x18] sm:$0xff] %v204_v3  ;;  %207 = vst [vmem:[%s1161_s6 + $0x20] sm:$0xff] %v206_v4  ;;  %v214_v8 = vld [vmem:[%s1153_s5 + $0x80] sm:$0xff]  ;;  %v216_v9 = vld [vmem:[%s1153_s5 + $0x88] sm:$0xff] }
  0x17   : > { %209 = vst [vmem:[%s1161_s6 + $0x28] sm:$0xff] %v208_v5  ;;  %211 = vst [vmem:[%s1161_s6 + $0x30] sm:$0xff] %v210_v6  ;;  %v218_v10 = vld [vmem:[%s1153_s5 + $0x90] sm:$0xff]  ;;  %v220_v11 = vld [vmem:[%s1153_s5 + $0x98] sm:$0xff] }
  0x18   : > { %213 = vst [vmem:[%s1161_s6 + $0x38] sm:$0xff] %v212_v7  ;;  %215 = vst [vmem:[%s1161_s6 + $0x40] sm:$0xff] %v214_v8  ;;  %v222_v12 = vld [vmem:[%s1153_s5 + $0xc0] sm:$0xff]  ;;  %v224_v13 = vld [vmem:[%s1153_s5 + $0xc8] sm:$0xff] }
  0x19   : > { %217 = vst [vmem:[%s1161_s6 + $0x48] sm:$0xff] %v216_v9  ;;  %219 = vst [vmem:[%s1161_s6 + $0x50] sm:$0xff] %v218_v10  ;;  %v226_v14 = vld [vmem:[%s1153_s5 + $0xd0] sm:$0xff]  ;;  %v228_v15 = vld [vmem:[%s1153_s5 + $0xd8] sm:$0xff] }
  0x1a   : > { %221 = vst [vmem:[%s1161_s6 + $0x58] sm:$0xff] %v220_v11  ;;  %223 = vst [vmem:[%s1161_s6 + $0x60] sm:$0xff] %v222_v12  ;;  %v230_v16 = vld [vmem:[%s1153_s5 + $0x100] sm:$0xff]  ;;  %v232_v17 = vld [vmem:[%s1153_s5 + $0x108] sm:$0xff] }
  0x1b   : > { %225 = vst [vmem:[%s1161_s6 + $0x68] sm:$0xff] %v224_v13  ;;  %227 = vst [vmem:[%s1161_s6 + $0x70] sm:$0xff] %v226_v14  ;;  %v234_v18 = vld [vmem:[%s1153_s5 + $0x110] sm:$0xff]  ;;  %v236_v19 = vld [vmem:[%s1153_s5 + $0x118] sm:$0xff] }
  0x1c   : > { %229 = vst [vmem:[%s1161_s6 + $0x78] sm:$0xff] %v228_v15  ;;  %231 = vst [vmem:[%s1161_s6 + $0x80] sm:$0xff] %v230_v16  ;;  %v238_v20 = vld [vmem:[%s1153_s5 + $0x140] sm:$0xff]  ;;  %v240_v21 = vld [vmem:[%s1153_s5 + $0x148] sm:$0xff] }
  0x1d   : > { %233 = vst [vmem:[%s1161_s6 + $0x88] sm:$0xff] %v232_v17  ;;  %235 = vst [vmem:[%s1161_s6 + $0x90] sm:$0xff] %v234_v18  ;;  %v242_v22 = vld [vmem:[%s1153_s5 + $0x150] sm:$0xff]  ;;  %v244_v23 = vld [vmem:[%s1153_s5 + $0x158] sm:$0xff] }
  0x1e   : > { %237 = vst [vmem:[%s1161_s6 + $0x98] sm:$0xff] %v236_v19  ;;  %239 = vst [vmem:[%s1161_s6 + $0xa0] sm:$0xff] %v238_v20  ;;  %v246_v24 = vld [vmem:[%s1153_s5 + $0x180] sm:$0xff]  ;;  %v248_v25 = vld [vmem:[%s1153_s5 + $0x188] sm:$0xff] }
  0x1f   : > { %241 = vst [vmem:[%s1161_s6 + $0xa8] sm:$0xff] %v240_v21  ;;  %243 = vst [vmem:[%s1161_s6 + $0xb0] sm:$0xff] %v242_v22  ;;  %v250_v26 = vld [vmem:[%s1153_s5 + $0x190] sm:$0xff]  ;;  %v252_v27 = vld [vmem:[%s1153_s5 + $0x198] sm:$0xff] }
  0x20   : > { %245 = vst [vmem:[%s1161_s6 + $0xb8] sm:$0xff] %v244_v23  ;;  %247 = vst [vmem:[%s1161_s6 + $0xc0] sm:$0xff] %v246_v24  ;;  %v254_v28 = vld [vmem:[%s1153_s5 + $0x1c0] sm:$0xff]  ;;  %v256_v29 = vld [vmem:[%s1153_s5 + $0x1c8] sm:$0xff] }
  0x21   : > { %249 = vst [vmem:[%s1161_s6 + $0xc8] sm:$0xff] %v248_v25  ;;  %251 = vst [vmem:[%s1161_s6 + $0xd0] sm:$0xff] %v250_v26  ;;  %v258_v30 = vld [vmem:[%s1153_s5 + $0x1d0] sm:$0xff]  ;;  %v260_v31 = vld [vmem:[%s1153_s5 + $0x1d8] sm:$0xff] }
  0x22   : > { %253 = vst [vmem:[%s1161_s6 + $0xd8] sm:$0xff] %v252_v27  ;;  %255 = vst [vmem:[%s1161_s6 + $0xe0] sm:$0xff] %v254_v28  ;;  %v262_v32 = vld [vmem:[%s1153_s5 + $0x200] sm:$0xff]  ;;  %v264_v33 = vld [vmem:[%s1153_s5 + $0x208] sm:$0xff] }
  0x23   : > { %257 = vst [vmem:[%s1161_s6 + $0xe8] sm:$0xff] %v256_v29  ;;  %259 = vst [vmem:[%s1161_s6 + $0xf0] sm:$0xff] %v258_v30  ;;  %v266_v34 = vld [vmem:[%s1153_s5 + $0x210] sm:$0xff]  ;;  %v268_v35 = vld [vmem:[%s1153_s5 + $0x218] sm:$0xff] }
  0x24   : > { %261 = vst [vmem:[%s1161_s6 + $0xf8] sm:$0xff] %v260_v31  ;;  %263 = vst [vmem:[%s1161_s6 + $0x100] sm:$0xff] %v262_v32  ;;  %v270_v36 = vld [vmem:[%s1153_s5 + $0x240] sm:$0xff]  ;;  %v272_v37 = vld [vmem:[%s1153_s5 + $0x248] sm:$0xff] }
  0x25   : > { %265 = vst [vmem:[%s1161_s6 + $0x108] sm:$0xff] %v264_v33  ;;  %267 = vst [vmem:[%s1161_s6 + $0x110] sm:$0xff] %v266_v34  ;;  %v274_v38 = vld [vmem:[%s1153_s5 + $0x250] sm:$0xff]  ;;  %v276_v39 = vld [vmem:[%s1153_s5 + $0x258] sm:$0xff] }
  0x26   : > { %269 = vst [vmem:[%s1161_s6 + $0x118] sm:$0xff] %v268_v35  ;;  %271 = vst [vmem:[%s1161_s6 + $0x120] sm:$0xff] %v270_v36  ;;  %v278_v40 = vld [vmem:[%s1153_s5 + $0x280] sm:$0xff]  ;;  %v280_v41 = vld [vmem:[%s1153_s5 + $0x288] sm:$0xff] }
  0x27   : > { %273 = vst [vmem:[%s1161_s6 + $0x128] sm:$0xff] %v272_v37  ;;  %275 = vst [vmem:[%s1161_s6 + $0x130] sm:$0xff] %v274_v38  ;;  %v282_v42 = vld [vmem:[%s1153_s5 + $0x290] sm:$0xff]  ;;  %v284_v43 = vld [vmem:[%s1153_s5 + $0x298] sm:$0xff] }
  0x28   : > { %277 = vst [vmem:[%s1161_s6 + $0x138] sm:$0xff] %v276_v39  ;;  %279 = vst [vmem:[%s1161_s6 + $0x140] sm:$0xff] %v278_v40  ;;  %v286_v44 = vld [vmem:[%s1153_s5 + $0x2c0] sm:$0xff]  ;;  %v288_v45 = vld [vmem:[%s1153_s5 + $0x2c8] sm:$0xff] }
  0x29   : > { %281 = vst [vmem:[%s1161_s6 + $0x148] sm:$0xff] %v280_v41  ;;  %283 = vst [vmem:[%s1161_s6 + $0x150] sm:$0xff] %v282_v42  ;;  %v290_v46 = vld [vmem:[%s1153_s5 + $0x2d0] sm:$0xff]  ;;  %v292_v47 = vld [vmem:[%s1153_s5 + $0x2d8] sm:$0xff] }
  0x2a   : > { %285 = vst [vmem:[%s1161_s6 + $0x158] sm:$0xff] %v284_v43  ;;  %287 = vst [vmem:[%s1161_s6 + $0x160] sm:$0xff] %v286_v44  ;;  %v294_v48 = vld [vmem:[%s1153_s5 + $0x300] sm:$0xff]  ;;  %v296_v49 = vld [vmem:[%s1153_s5 + $0x308] sm:$0xff] }
  0x2b   : > { %289 = vst [vmem:[%s1161_s6 + $0x168] sm:$0xff] %v288_v45  ;;  %291 = vst [vmem:[%s1161_s6 + $0x170] sm:$0xff] %v290_v46  ;;  %v298_v50 = vld [vmem:[%s1153_s5 + $0x310] sm:$0xff]  ;;  %v300_v51 = vld [vmem:[%s1153_s5 + $0x318] sm:$0xff] }
  0x2c   : > { %293 = vst [vmem:[%s1161_s6 + $0x178] sm:$0xff] %v292_v47  ;;  %295 = vst [vmem:[%s1161_s6 + $0x180] sm:$0xff] %v294_v48  ;;  %v302_v52 = vld [vmem:[%s1153_s5 + $0x340] sm:$0xff]  ;;  %v304_v53 = vld [vmem:[%s1153_s5 + $0x348] sm:$0xff] }
  0x2d   : > { %297 = vst [vmem:[%s1161_s6 + $0x188] sm:$0xff] %v296_v49  ;;  %299 = vst [vmem:[%s1161_s6 + $0x190] sm:$0xff] %v298_v50  ;;  %v306_v54 = vld [vmem:[%s1153_s5 + $0x350] sm:$0xff]  ;;  %v308_v55 = vld [vmem:[%s1153_s5 + $0x358] sm:$0xff] }
  0x2e   : > { %301 = vst [vmem:[%s1161_s6 + $0x198] sm:$0xff] %v300_v51  ;;  %303 = vst [vmem:[%s1161_s6 + $0x1a0] sm:$0xff] %v302_v52  ;;  %v310_v56 = vld [vmem:[%s1153_s5 + $0x380] sm:$0xff]  ;;  %v312_v57 = vld [vmem:[%s1153_s5 + $0x388] sm:$0xff] }
  0x2f   : > { %305 = vst [vmem:[%s1161_s6 + $0x1a8] sm:$0xff] %v304_v53  ;;  %307 = vst [vmem:[%s1161_s6 + $0x1b0] sm:$0xff] %v306_v54  ;;  %v314_v58 = vld [vmem:[%s1153_s5 + $0x390] sm:$0xff]  ;;  %v316_v59 = vld [vmem:[%s1153_s5 + $0x398] sm:$0xff] }
  0x30   : > { %309 = vst [vmem:[%s1161_s6 + $0x1b8] sm:$0xff] %v308_v55  ;;  %311 = vst [vmem:[%s1161_s6 + $0x1c0] sm:$0xff] %v310_v56  ;;  %v318_v60 = vld [vmem:[%s1153_s5 + $0x3c0] sm:$0xff]  ;;  %v320_v61 = vld [vmem:[%s1153_s5 + $0x3c8] sm:$0xff] }
  0x31   : > { %313 = vst [vmem:[%s1161_s6 + $0x1c8] sm:$0xff] %v312_v57  ;;  %315 = vst [vmem:[%s1161_s6 + $0x1d0] sm:$0xff] %v314_v58  ;;  %v322_v62 = vld [vmem:[%s1153_s5 + $0x3d0] sm:$0xff]  ;;  %v324_v63 = vld [vmem:[%s1153_s5 + $0x3d8] sm:$0xff] }
  0x32   : > { %317 = vst [vmem:[%s1161_s6 + $0x1d8] sm:$0xff] %v316_v59  ;;  %319 = vst [vmem:[%s1161_s6 + $0x1e0] sm:$0xff] %v318_v60  ;;  %v326_v0 = vld [vmem:[%s1153_s5 + $0x400] sm:$0xff]  ;;  %v328_v1 = vld [vmem:[%s1153_s5 + $0x408] sm:$0xff] }
  0x33   : > { %321 = vst [vmem:[%s1161_s6 + $0x1e8] sm:$0xff] %v320_v61  ;;  %323 = vst [vmem:[%s1161_s6 + $0x1f0] sm:$0xff] %v322_v62  ;;  %v330_v2 = vld [vmem:[%s1153_s5 + $0x410] sm:$0xff]  ;;  %v332_v3 = vld [vmem:[%s1153_s5 + $0x418] sm:$0xff] }
  0x34   : > { %325 = vst [vmem:[%s1161_s6 + $0x1f8] sm:$0xff] %v324_v63  ;;  %327 = vst [vmem:[%s1161_s6 + $0x200] sm:$0xff] %v326_v0  ;;  %v334_v4 = vld [vmem:[%s1153_s5 + $0x440] sm:$0xff]  ;;  %v336_v5 = vld [vmem:[%s1153_s5 + $0x448] sm:$0xff] }
  0x35   : > { %329 = vst [vmem:[%s1161_s6 + $0x208] sm:$0xff] %v328_v1  ;;  %331 = vst [vmem:[%s1161_s6 + $0x210] sm:$0xff] %v330_v2  ;;  %v338_v6 = vld [vmem:[%s1153_s5 + $0x450] sm:$0xff]  ;;  %v340_v7 = vld [vmem:[%s1153_s5 + $0x458] sm:$0xff] }
  0x36   : > { %333 = vst [vmem:[%s1161_s6 + $0x218] sm:$0xff] %v332_v3  ;;  %335 = vst [vmem:[%s1161_s6 + $0x220] sm:$0xff] %v334_v4 }
  0x37   : > { %337 = vst [vmem:[%s1161_s6 + $0x228] sm:$0xff] %v336_v5  ;;  %339 = vst [vmem:[%s1161_s6 + $0x230] sm:$0xff] %v338_v6 }
  0x38   : > { %341 = vst [vmem:[%s1161_s6 + $0x238] sm:$0xff] %v340_v7 }
  0x39 PF: > { %p976_p8 = scmp.ge.s32.totalorder %s1077_s19, 1  ;;  %p346_p9 = scmp.lt.s32.totalorder %s1077_s19, 3 }
  0x3b   : > { %p347_p10 = pnand %p976_p8, %p346_p9 }
  0x3c   : > { %s353_s7 = sand.u32 (!%p347_p10), 1, %s1061_s15   ;;  %p986_p11 = scmp.ne.s32.totalorder (!%p347_p10), %s1069_s17, 0 }
  0x3d   : > { %350 = sbr.rel (%p347_p10) target bundleno = 476 (0x1dc), region = 47  ;;  %s977_s9 = sshll.u32 (!%p347_p10), %s353_s7, 7 }
  0x3e   : > { %s997_s10 = smul.u32 (!%p347_p10), 576, %s353_s7 }
  0x40   : > { %s1311_s11 = scalar_lea.vmem (!%p347_p10), [#allocation2], %s997_s10  ;;  %s1414_s10 = scalar_lea.vmem (!%p347_p10), [#allocation3], %s977_s9 }
  0x42   : > { %v400_v8 = vld [vmem:[%s1563_s1 + $0x8] sm:$0xff]  ;;  %vm479_vm0 = vcmask 130048   ;;  %v470_v10 = vld [vmem:[%s1311_s11 + $0x1f8] sm:$0xff]  ;;  %v467_v11 = vld [vmem:[%s1311_s11 + $0x1e0] sm:$0xff] }
  0x43   : > { %978 = vmatprep.mubr.msk.f32.mxu0 %vm479_vm0, %v400_v8  ;;  %982 = vmatprep.mubr.msk.f32.mxu1 %vm479_vm0, %v400_v8  ;;  %v468_v9 = vld [vmem:[%s1311_s11 + $0x1e8] sm:$0xff]  ;;  %v469_v12 = vld [vmem:[%s1311_s11 + $0x1f0] sm:$0xff]  ;;  %v466_v14 = vld [vmem:[%s1311_s11 + $0x1d8] sm:$0xff] }
  0x44   : > { %492 = vmatprep.subr.mxu0 %v468_v9  ;;  %581 = vmatprep.subr.mxu1 %v470_v10  ;;  %v464_v13 = vld [vmem:[%s1311_s11 + $0x1c8] sm:$0xff]  ;;  %v463_v15 = vld [vmem:[%s1311_s11 + $0x1c0] sm:$0xff]  ;;  %v465_v16 = vld [vmem:[%s1311_s11 + $0x1d0] sm:$0xff] }
  0x45   : > { %493 = vmatpush1.msra.mxu0 %v467_v11  ;;  %582 = vmatpush1.msra.mxu1 %v469_v12  ;;  %v460_v17 = vld [vmem:[%s1311_s11 + $0x1a8] sm:$0xff]  ;;  %v462_v18 = vld [vmem:[%s1311_s11 + $0x1b8] sm:$0xff]  ;;  %v459_v19 = vld [vmem:[%s1311_s11 + $0x1a0] sm:$0xff] }
  0x46   : > { %494 = vmatprep.subr.mxu0 %v464_v13  ;;  %583 = vmatprep.subr.mxu1 %v466_v14  ;;  %v461_v20 = vld [vmem:[%s1311_s11 + $0x1b0] sm:$0xff]  ;;  %v456_v21 = vld [vmem:[%s1311_s11 + $0x188] sm:$0xff]  ;;  %v458_v22 = vld [vmem:[%s1311_s11 + $0x198] sm:$0xff] }
  0x47   : > { %495 = vmatpush1.msra.mxu0 %v463_v15  ;;  %584 = vmatpush1.msra.mxu1 %v465_v16  ;;  %v455_v23 = vld [vmem:[%s1311_s11 + $0x180] sm:$0xff]  ;;  %v457_v24 = vld [vmem:[%s1311_s11 + $0x190] sm:$0xff]  ;;  %v452_v25 = vld [vmem:[%s1311_s11 + $0x168] sm:$0xff] }
  0x48   : > { %496 = vmatprep.subr.mxu0 %v460_v17  ;;  %585 = vmatprep.subr.mxu1 %v462_v18  ;;  %v454_v26 = vld [vmem:[%s1311_s11 + $0x178] sm:$0xff]  ;;  %v451_v27 = vld [vmem:[%s1311_s11 + $0x160] sm:$0xff]  ;;  %v453_v28 = vld [vmem:[%s1311_s11 + $0x170] sm:$0xff] }
  0x49   : > { %497 = vmatpush1.msra.mxu0 %v459_v19  ;;  %586 = vmatpush1.msra.mxu1 %v461_v20  ;;  %v448_v29 = vld [vmem:[%s1311_s11 + $0x148] sm:$0xff]  ;;  %v450_v30 = vld [vmem:[%s1311_s11 + $0x158] sm:$0xff]  ;;  %v447_v31 = vld [vmem:[%s1311_s11 + $0x140] sm:$0xff] }
  0x4a   : > { %498 = vmatprep.subr.mxu0 %v456_v21  ;;  %587 = vmatprep.subr.mxu1 %v458_v22  ;;  %v449_v32 = vld [vmem:[%s1311_s11 + $0x150] sm:$0xff]  ;;  %v444_v33 = vld [vmem:[%s1311_s11 + $0x128] sm:$0xff]  ;;  %v446_v34 = vld [vmem:[%s1311_s11 + $0x138] sm:$0xff] }
  0x4b   : > { %499 = vmatpush1.msra.mxu0 %v455_v23  ;;  %588 = vmatpush1.msra.mxu1 %v457_v24  ;;  %v443_v35 = vld [vmem:[%s1311_s11 + $0x120] sm:$0xff]  ;;  %v445_v36 = vld [vmem:[%s1311_s11 + $0x130] sm:$0xff]  ;;  %v440_v37 = vld [vmem:[%s1311_s11 + $0x108] sm:$0xff] }
  0x4c   : > { %500 = vmatprep.subr.mxu0 %v452_v25  ;;  %589 = vmatprep.subr.mxu1 %v454_v26  ;;  %v442_v38 = vld [vmem:[%s1311_s11 + $0x118] sm:$0xff]  ;;  %v439_v39 = vld [vmem:[%s1311_s11 + $0x100] sm:$0xff]  ;;  %v441_v40 = vld [vmem:[%s1311_s11 + $0x110] sm:$0xff] }
  0x4d   : > { %501 = vmatpush1.msra.mxu0 %v451_v27  ;;  %590 = vmatpush1.msra.mxu1 %v453_v28  ;;  %v436_v41 = vld [vmem:[%s1311_s11 + $0xe8] sm:$0xff]  ;;  %v438_v42 = vld [vmem:[%s1311_s11 + $0xf8] sm:$0xff]  ;;  %v435_v43 = vld [vmem:[%s1311_s11 + $0xe0] sm:$0xff] }
  0x4e   : > { %502 = vmatprep.subr.mxu0 %v448_v29  ;;  %591 = vmatprep.subr.mxu1 %v450_v30  ;;  %v437_v44 = vld [vmem:[%s1311_s11 + $0xf0] sm:$0xff]  ;;  %v432_v45 = vld [vmem:[%s1311_s11 + $0xc8] sm:$0xff]  ;;  %v434_v46 = vld [vmem:[%s1311_s11 + $0xd8] sm:$0xff] }
  0x4f   : > { %503 = vmatpush1.msra.mxu0 %v447_v31  ;;  %592 = vmatpush1.msra.mxu1 %v449_v32  ;;  %v431_v47 = vld [vmem:[%s1311_s11 + $0xc0] sm:$0xff]  ;;  %v433_v48 = vld [vmem:[%s1311_s11 + $0xd0] sm:$0xff]  ;;  %v428_v49 = vld [vmem:[%s1311_s11 + $0xa8] sm:$0xff] }
  0x50   : > { %504 = vmatprep.subr.mxu0 %v444_v33  ;;  %593 = vmatprep.subr.mxu1 %v446_v34  ;;  %v430_v50 = vld [vmem:[%s1311_s11 + $0xb8] sm:$0xff]  ;;  %v427_v51 = vld [vmem:[%s1311_s11 + $0xa0] sm:$0xff]  ;;  %v429_v52 = vld [vmem:[%s1311_s11 + $0xb0] sm:$0xff] }
  0x51   : > { %505 = vmatpush1.msra.mxu0 %v443_v35  ;;  %594 = vmatpush1.msra.mxu1 %v445_v36  ;;  %v424_v53 = vld [vmem:[%s1311_s11 + $0x88] sm:$0xff]  ;;  %v426_v54 = vld [vmem:[%s1311_s11 + $0x98] sm:$0xff]  ;;  %v423_v55 = vld [vmem:[%s1311_s11 + $0x80] sm:$0xff] }
  0x52   : > { %506 = vmatprep.subr.mxu0 %v440_v37  ;;  %595 = vmatprep.subr.mxu1 %v442_v38  ;;  %v425_v56 = vld [vmem:[%s1311_s11 + $0x90] sm:$0xff]  ;;  %v420_v57 = vld [vmem:[%s1311_s11 + $0x68] sm:$0xff]  ;;  %v422_v58 = vld [vmem:[%s1311_s11 + $0x78] sm:$0xff] }
  0x53   : > { %507 = vmatpush1.msra.mxu0 %v439_v39  ;;  %596 = vmatpush1.msra.mxu1 %v441_v40  ;;  %v419_v59 = vld [vmem:[%s1311_s11 + $0x60] sm:$0xff]  ;;  %v421_v60 = vld [vmem:[%s1311_s11 + $0x70] sm:$0xff]  ;;  %v416_v61 = vld [vmem:[%s1311_s11 + $0x48] sm:$0xff] }
  0x54   : > { %508 = vmatprep.subr.mxu0 %v436_v41  ;;  %597 = vmatprep.subr.mxu1 %v438_v42  ;;  %v418_v62 = vld [vmem:[%s1311_s11 + $0x58] sm:$0xff]  ;;  %v415_v63 = vld [vmem:[%s1311_s11 + $0x40] sm:$0xff]  ;;  %v417_v0 = vld [vmem:[%s1311_s11 + $0x50] sm:$0xff] }
  0x55   : > { %509 = vmatpush1.msra.mxu0 %v435_v43  ;;  %598 = vmatpush1.msra.mxu1 %v437_v44  ;;  %v412_v1 = vld [vmem:[%s1311_s11 + $0x28] sm:$0xff]  ;;  %v414_v2 = vld [vmem:[%s1311_s11 + $0x38] sm:$0xff]  ;;  %v411_v3 = vld [vmem:[%s1311_s11 + $0x20] sm:$0xff] }
  0x56   : > { %510 = vmatprep.subr.mxu0 %v432_v45  ;;  %599 = vmatprep.subr.mxu1 %v434_v46  ;;  %v413_v4 = vld [vmem:[%s1311_s11 + $0x30] sm:$0xff]  ;;  %v408_v5 = vld [vmem:[%s1311_s11 + $0x8] sm:$0xff]  ;;  %v410_v6 = vld [vmem:[%s1311_s11 + $0x18] sm:$0xff] }
  0x57   : > { %511 = vmatpush1.msra.mxu0 %v431_v47  ;;  %600 = vmatpush1.msra.mxu1 %v433_v48  ;;  %v407_v7 = vld [vmem:[%s1311_s11] sm:$0xff]  ;;  %v409_v8 = vld [vmem:[%s1311_s11 + $0x10] sm:$0xff]  ;;  %v476_v9 = vld [vmem:[%s1311_s11 + $0x228] sm:$0xff] }
  0x58   : > { %512 = vmatprep.subr.mxu0 %v428_v49  ;;  %601 = vmatprep.subr.mxu1 %v430_v50  ;;  %v478_v10 = vld [vmem:[%s1311_s11 + $0x238] sm:$0xff]  ;;  %v475_v11 = vld [vmem:[%s1311_s11 + $0x220] sm:$0xff]  ;;  %v477_v12 = vld [vmem:[%s1311_s11 + $0x230] sm:$0xff] }
  0x59   : > { %513 = vmatpush1.msra.mxu0 %v427_v51  ;;  %602 = vmatpush1.msra.mxu1 %v429_v52  ;;  %v472_v13 = vld [vmem:[%s1311_s11 + $0x208] sm:$0xff]  ;;  %v474_v14 = vld [vmem:[%s1311_s11 + $0x218] sm:$0xff]  ;;  %v471_v15 = vld [vmem:[%s1311_s11 + $0x200] sm:$0xff] }
  0x5a   : > { %514 = vmatprep.subr.mxu0 %v424_v53  ;;  %603 = vmatprep.subr.mxu1 %v426_v54  ;;  %v473_v16 = vld [vmem:[%s1311_s11 + $0x210] sm:$0xff]  ;;  %v399_v17 = vld [vmem:[%s1563_s1] sm:$0xff]  ;;  %v402_v18 = vld [vmem:[%s1563_s1 + $0x18] sm:$0xff] }
  0x5b   : > { %515 = vmatpush1.msra.mxu0 %v423_v55  ;;  %604 = vmatpush1.msra.mxu1 %v425_v56  ;;  %v401_v19 = vld [vmem:[%s1563_s1 + $0x10] sm:$0xff]  ;;  %v404_v20 = vld [vmem:[%s1563_s1 + $0x28] sm:$0xff]  ;;  %v403_v21 = vld [vmem:[%s1563_s1 + $0x20] sm:$0xff] }
  0x5c   : > { %516 = vmatprep.subr.mxu0 %v420_v57  ;;  %605 = vmatprep.subr.mxu1 %v422_v58  ;;  %v406_v22 = vld [vmem:[%s1563_s1 + $0x38] sm:$0xff]  ;;  %v405_v23 = vld [vmem:[%s1563_s1 + $0x30] sm:$0xff] }
  0x5d   : > { %517 = vmatpush1.msra.mxu0 %v419_v59  ;;  %606 = vmatpush1.msra.mxu1 %v421_v60 }
  0x5e   : > { %518 = vmatprep.subr.mxu0 %v416_v61  ;;  %607 = vmatprep.subr.mxu1 %v418_v62 }
  0x5f   : > { %519 = vmatpush1.msra.mxu0 %v415_v63  ;;  %608 = vmatpush1.msra.mxu1 %v417_v0 }
  0x60   : > { %520 = vmatprep.subr.mxu0 %v412_v1  ;;  %609 = vmatprep.subr.mxu1 %v414_v2 }
  0x61   : > { %521 = vmatpush1.msra.mxu0 %v411_v3  ;;  %610 = vmatpush1.msra.mxu1 %v413_v4 }
  0x62   : > { %522 = vmatprep.subr.mxu0 %v408_v5  ;;  %611 = vmatprep.subr.mxu1 %v410_v6 }
  0x63   : > { %523 = vmatpush1.msra.mxu0 %v407_v7  ;;  %612 = vmatpush1.msra.mxu1 %v409_v8 }
  0x64   : > { %552 = vmatprep.subr.mxu0 %v476_v9  ;;  %641 = vmatprep.subr.mxu1 %v478_v10 }
  0x65   : > { %553 = vmatpush2.msra.mxu0 %v475_v11  ;;  %642 = vmatpush2.msra.mxu1 %v477_v12 }
  0x66   : > { %554 = vmatprep.subr.mxu0 %v472_v13  ;;  %643 = vmatprep.subr.mxu1 %v474_v14 }
  0x67   : > { %555 = vmatpush2.msra.mxu0 %v471_v15  ;;  %644 = vmatpush2.msra.mxu1 %v473_v16 }
  0x68   : > { %557 = vmatmul.mubr.f32.vlgmr.msra.gmra.mxu0 %v399_v17  ;;  %646 = vmatmul.mubr.f32.vlgmr.msra.gmra.mxu1 %v399_v17 }
  0x69   : > { %979 = vmatprep.mubr.msk.f32.mxu0 %vm479_vm0, %v402_v18  ;;  %983 = vmatprep.mubr.msk.f32.mxu1 %vm479_vm0, %v402_v18 }
  0x6c   : > { %563 = vmatmul.mubr.f32.gmra.mxu0 %v401_v19  ;;  %652 = vmatmul.mubr.f32.gmra.mxu1 %v401_v19 }
  0x6d   : > { %980 = vmatprep.mubr.msk.f32.mxu0 %vm479_vm0, %v404_v20  ;;  %984 = vmatprep.mubr.msk.f32.mxu1 %vm479_vm0, %v404_v20 }
  0x70   : > { %569 = vmatmul.mubr.f32.gmra.mxu0 %v403_v21  ;;  %658 = vmatmul.mubr.f32.gmra.mxu1 %v403_v21 }
  0x71   : > { %981 = vmatprep.mubr.msk.f32.mxu0 %vm479_vm0, %v406_v22  ;;  %985 = vmatprep.mubr.msk.f32.mxu1 %vm479_vm0, %v406_v22 }
  0x74   : > { %575 = vmatmul.mubr.f32.gmra.mxu0 %v405_v23  ;;  %664 = vmatmul.mubr.f32.gmra.mxu1 %v405_v23 }
 0x128   : > { %v558_v24 = vpop.f32.mrf.mxu0  ;;  %v647_v25 = vpop.f32.mrf.mxu1 }
 0x129   : > { %670 = vst [vmem:[%s1414_s10] sm:$0xff] %v558_v24  ;;  %672 = vst [vmem:[%s1414_s10 + $0x10] sm:$0xff] %v647_v25 }
 0x12a   : > { %v560_v26 = vpop.f32.mrf.mxu0  ;;  %v1418_v27 = vpop.f32.mrf.mxu1 }
 0x12b   : > { %671 = vst [vmem:[%s1414_s10 + $0x8] sm:$0xff] %v560_v26  ;;  %673 = vst [vmem:[%s1414_s10 + $0x18] sm:$0xff] %v1418_v27 }
 0x12c   : > { %v564_v28 = vpop.f32.mrf.mxu0  ;;  %v653_v29 = vpop.f32.mrf.mxu1 }
 0x12d   : > { %674 = vst [vmem:[%s1414_s10 + $0x20] sm:$0xff] %v564_v28  ;;  %676 = vst [vmem:[%s1414_s10 + $0x30] sm:$0xff] %v653_v29 }
 0x12e   : > { %v566_v30 = vpop.f32.mrf.mxu0  ;;  %v655_v31 = vpop.f32.mrf.mxu1 }
 0x12f   : > { %675 = vst [vmem:[%s1414_s10 + $0x28] sm:$0xff] %v566_v30  ;;  %677 = vst [vmem:[%s1414_s10 + $0x38] sm:$0xff] %v655_v31 }
 0x130   : > { %v570_v32 = vpop.f32.mrf.mxu0  ;;  %v659_v33 = vpop.f32.mrf.mxu1 }
 0x131   : > { %678 = vst [vmem:[%s1414_s10 + $0x40] sm:$0xff] %v570_v32  ;;  %680 = vst [vmem:[%s1414_s10 + $0x50] sm:$0xff] %v659_v33 }
 0x132   : > { %v572_v34 = vpop.f32.mrf.mxu0  ;;  %v1429_v35 = vpop.f32.mrf.mxu1 }
 0x133   : > { %679 = vst [vmem:[%s1414_s10 + $0x48] sm:$0xff] %v572_v34  ;;  %681 = vst [vmem:[%s1414_s10 + $0x58] sm:$0xff] %v1429_v35  ;;  %689 = sbr.rel (%p986_p11) target bundleno = 317 (0x13d), region = 55 }
 0x134   : > { %v576_v36 = vpop.f32.mrf.mxu0  ;;  %v665_v37 = vpop.f32.mrf.mxu1 }
 0x135   : > { %682 = vst [vmem:[%s1414_s10 + $0x60] sm:$0xff] %v576_v36  ;;  %684 = vst [vmem:[%s1414_s10 + $0x70] sm:$0xff] %v665_v37 }
 0x136   : > { %v578_v38 = vpop.f32.mrf.mxu0  ;;  %v667_v39 = vpop.f32.mrf.mxu1 }
 0x137   : > { %683 = vst [vmem:[%s1414_s10 + $0x68] sm:$0xff] %v578_v38  ;;  %685 = vst [vmem:[%s1414_s10 + $0x78] sm:$0xff] %v667_v39 }
 0x138   : > { %vm690_vm1 = vcmask 7168   ;;  %v1079_v40 = vmov 0.0  }
 0x139   : > { %691 = vst.msk [vmem:[%s1565_s3] sm:$0xff] %vm690_vm1, %v1079_v40  ;;  %692 = vst.msk [vmem:[%s1565_s3 + $0x8] sm:$0xff] %vm690_vm1, %v1079_v40 }
 0x13a   : > { %693 = vst.msk [vmem:[%s1565_s3 + $0x10] sm:$0xff] %vm690_vm1, %v1079_v40  ;;  %694 = vst.msk [vmem:[%s1565_s3 + $0x18] sm:$0xff] %vm690_vm1, %v1079_v40 }
 0x13b   : > { %695 = vst.msk [vmem:[%s1566_s4] sm:$0xff] %vm690_vm1, %v1079_v40  ;;  %696 = vst.msk [vmem:[%s1566_s4 + $0x8] sm:$0xff] %vm690_vm1, %v1079_v40 }
 0x13c   : > { %697 = vst.msk [vmem:[%s1566_s4 + $0x10] sm:$0xff] %vm690_vm1, %v1079_v40  ;;  %698 = vst.msk [vmem:[%s1566_s4 + $0x18] sm:$0xff] %vm690_vm1, %v1079_v40 }
 0x13d PF: > { %v713_v41 = vadd.f32 %v572_v34, %v570_v32  ;;  %v703_v42 = vadd.f32 %v560_v26, %v558_v24  ;;  %v718_v43 = vadd.f32 %v578_v38, %v576_v36  ;;  %v708_v44 = vadd.f32 %v566_v30, %v564_v28  ;;  %s995_s29 = sshll.u32 (%p1140_p6), %s1069_s17, 5 }
 0x13e   : > { %v740_v45 = vmul.f32 %v564_v28, %v564_v28  ;;  %v741_v46 = vmul.f32 %v566_v30, %v566_v30  ;;  %v742_v47 = vmul.f32 %v653_v29, %v653_v29  ;;  %v736_v53 = vmul.f32 %v558_v24, %v558_v24  ;;  %s801_s6 = scalar_lea.vmem (%p1140_p6), %s1564_s2, %s995_s29 }
 0x13f   : > { %v714_v48 = vadd.f32 %v713_v41, %v659_v33  ;;  %v704_v49 = vadd.f32 %v703_v42, %v647_v25  ;;  %v719_v50 = vadd.f32 %v718_v43, %v665_v37  ;;  %v709_v51 = vadd.f32 %v708_v44, %v653_v29  ;;  %v814_v41 = vld [vmem:[%s1414_s10] sm:$0xff] (%p1140_p6)  ;;  %v816_v42 = vld [vmem:[%s1414_s10 + $0x8] sm:$0xff] (%p1140_p6)  ;;  %v818_v43 = vld [vmem:[%s1414_s10 + $0x10] sm:$0xff] (%p1140_p6) }
 0x140   : > { %v757_v52 = vadd.f32 %v741_v46, %v740_v45  ;;  %v737_v54 = vmul.f32 %v560_v26, %v560_v26  ;;  %v738_v55 = vmul.f32 %v647_v25, %v647_v25  ;;  %v743_v59 = vmul.f32 %v655_v31, %v655_v31  ;;  %v699_v18 = vld [vmem:[%s1565_s3] sm:$0xff]  ;;  %v700_v24 = vld [vmem:[%s1565_s3 + $0x8] sm:$0xff]  ;;  %v820_v44 = vld [vmem:[%s1414_s10 + $0x18] sm:$0xff] (%p1140_p6)  ;;  %815 = vst [vmem:[%s801_s6] sm:$0xff] (%p1140_p6), %v814_v41 }
 0x141   : > { %v715_v56 = vadd.f32 %v714_v48, %v1429_v35  ;;  %v705_v57 = vadd.f32 %v704_v49, %v1418_v27  ;;  %v720_v58 = vadd.f32 %v719_v50, %v667_v39  ;;  %v710_v60 = vadd.f32 %v709_v51, %v655_v31  ;;  %v701_v17 = vld [vmem:[%s1565_s3 + $0x10] sm:$0xff]  ;;  %v702_v23 = vld [vmem:[%s1565_s3 + $0x18] sm:$0xff]  ;;  %v822_v45 = vld [vmem:[%s1414_s10 + $0x20] sm:$0xff] (%p1140_p6)  ;;  %817 = vst [vmem:[%s801_s6 + $0x8] sm:$0xff] (%p1140_p6), %v816_v42 }
 0x142   : > { %v758_v61 = vadd.f32 %v757_v52, %v742_v47  ;;  %v752_v62 = vadd.f32 %v737_v54, %v736_v53  ;;  %v748_v63 = vmul.f32 %v576_v36, %v576_v36  ;;  %v739_v0 = vmul.f32 %v1418_v27, %v1418_v27  ;;  %v733_v29 = vld [vmem:[%s1566_s4 + $0x8] sm:$0xff]  ;;  %v732_v30 = vld [vmem:[%s1566_s4] sm:$0xff]  ;;  %819 = vst [vmem:[%s801_s6 + $0x10] sm:$0xff] (%p1140_p6), %v818_v43  ;;  %v826_v47 = vld [vmem:[%s1414_s10 + $0x30] sm:$0xff] (%p1140_p6) }
 0x143   : > { %716 = vadd.xlane.f32.xlu1 %v715_v56  ;;  %706 = vadd.xlane.f32.xlu0 %v705_v57  ;;  %v749_v1 = vmul.f32 %v578_v38, %v578_v38  ;;  %v750_v2 = vmul.f32 %v665_v37, %v665_v37  ;;  %v744_v4 = vmul.f32 %v570_v32, %v570_v32  ;;  %vm727_vm2 = vcmask 7168   ;;  %v734_v36 = vld [vmem:[%s1566_s4 + $0x10] sm:$0xff]  ;;  %v824_v46 = vld [vmem:[%s1414_s10 + $0x28] sm:$0xff] (%p1140_p6)  ;;  %v828_v48 = vld [vmem:[%s1414_s10 + $0x38] sm:$0xff] (%p1140_p6) }
 0x144   : > { %v753_v3 = vadd.f32 %v752_v62, %v738_v55  ;;  %v745_v5 = vmul.f32 %v572_v34, %v572_v34  ;;  %v746_v7 = vmul.f32 %v659_v33, %v659_v33  ;;  %v759_v8 = vadd.f32 %v758_v61, %v743_v59  ;;  %821 = vst [vmem:[%s801_s6 + $0x18] sm:$0xff] (%p1140_p6), %v820_v44  ;;  %v830_v49 = vld [vmem:[%s1414_s10 + $0x40] sm:$0xff] (%p1140_p6)  ;;  %v832_v50 = vld [vmem:[%s1414_s10 + $0x48] sm:$0xff] (%p1140_p6)  ;;  %v834_v51 = vld [vmem:[%s1414_s10 + $0x50] sm:$0xff] (%p1140_p6) }
 0x145   : > { %v767_v6 = vadd.f32 %v749_v1, %v748_v63  ;;  %v751_v9 = vmul.f32 %v667_v39, %v667_v39  ;;  %v747_v13 = vmul.f32 %v1429_v35, %v1429_v35  ;;  %v735_v35 = vld [vmem:[%s1566_s4 + $0x18] sm:$0xff]  ;;  %823 = vst [vmem:[%s801_s6 + $0x40] sm:$0xff] (%p1140_p6), %v822_v45  ;;  %825 = vst [vmem:[%s801_s6 + $0x48] sm:$0xff] (%p1140_p6), %v824_v46  ;;  %v838_v53 = vld [vmem:[%s1414_s10 + $0x60] sm:$0xff] (%p1140_p6) }
 0x146   : > { %v762_v10 = vadd.f32 %v745_v5, %v744_v4  ;;  %v754_v11 = vadd.f32 %v753_v3, %v739_v0  ;;  %827 = vst [vmem:[%s801_s6 + $0x50] sm:$0xff] (%p1140_p6), %v826_v47  ;;  %829 = vst [vmem:[%s801_s6 + $0x58] sm:$0xff] (%p1140_p6), %v828_v48  ;;  %v836_v52 = vld [vmem:[%s1414_s10 + $0x58] sm:$0xff] (%p1140_p6)  ;;  %v840_v54 = vld [vmem:[%s1414_s10 + $0x68] sm:$0xff] (%p1140_p6) }
 0x147   : > { %721 = vadd.xlane.f32.xlu1 %v720_v58  ;;  %711 = vadd.xlane.f32.xlu0 %v710_v60  ;;  %v768_v12 = vadd.f32 %v767_v6, %v750_v2  ;;  %831 = vst [vmem:[%s801_s6 + $0x80] sm:$0xff] (%p1140_p6), %v830_v49  ;;  %833 = vst [vmem:[%s801_s6 + $0x88] sm:$0xff] (%p1140_p6), %v832_v50  ;;  %v842_v55 = vld [vmem:[%s1414_s10 + $0x70] sm:$0xff] (%p1140_p6)  ;;  %v844_v56 = vld [vmem:[%s1414_s10 + $0x78] sm:$0xff] (%p1140_p6) }
 0x148   : > { %v763_v14 = vadd.f32 %v762_v10, %v746_v7  ;;  %835 = vst [vmem:[%s801_s6 + $0x90] sm:$0xff] (%p1140_p6), %v834_v51  ;;  %837 = vst [vmem:[%s801_s6 + $0x98] sm:$0xff] (%p1140_p6), %v836_v52 }
 0x149   : > { %v769_v15 = vadd.f32 %v768_v12, %v751_v9  ;;  %839 = vst [vmem:[%s801_s6 + $0xc0] sm:$0xff] (%p1140_p6), %v838_v53  ;;  %841 = vst [vmem:[%s801_s6 + $0xc8] sm:$0xff] (%p1140_p6), %v840_v54 }
 0x14a   : > { %v764_v16 = vadd.f32 %v763_v14, %v747_v13  ;;  %843 = vst [vmem:[%s801_s6 + $0xd0] sm:$0xff] (%p1140_p6), %v842_v55  ;;  %845 = vst [vmem:[%s801_s6 + $0xd8] sm:$0xff] (%p1140_p6), %v844_v56 }
 0x14b   : > { %760 = vadd.xlane.f32.xlu1 %v759_v8  ;;  %755 = vadd.xlane.f32.xlu0 %v754_v11 }
 0x14f   : > { %770 = vadd.xlane.f32.xlu1 %v769_v15  ;;  %765 = vadd.xlane.f32.xlu0 %v764_v16 }
 0x1cc   : > { %v717_v19 = vpop.xlane.xlu1 %716  ;;  %v707_v20 = vpop.xlane.xlu0 %706 }
 0x1cd   : > { %v725_v21 = vadd.f32 %v717_v19, %v701_v17  ;;  %v723_v22 = vadd.f32 %v707_v20, %v699_v18 }
 0x1cf   : > { %730 = vst.msk [vmem:[%s1565_s3 + $0x10] sm:$0xff] %vm727_vm2, %v725_v21  ;;  %728 = vst.msk [vmem:[%s1565_s3] sm:$0xff] %vm727_vm2, %v723_v22 }
 0x1d0   : > { %v722_v25 = vpop.xlane.xlu1 %721  ;;  %v712_v26 = vpop.xlane.xlu0 %711 }
 0x1d1   : > { %v726_v27 = vadd.f32 %v722_v25, %v702_v23  ;;  %v724_v28 = vadd.f32 %v712_v26, %v700_v24 }
 0x1d3   : > { %731 = vst.msk [vmem:[%s1565_s3 + $0x18] sm:$0xff] %vm727_vm2, %v726_v27  ;;  %729 = vst.msk [vmem:[%s1565_s3 + $0x8] sm:$0xff] %vm727_vm2, %v724_v28 }
 0x1d4   : > { %v761_v31 = vpop.xlane.xlu1 %760  ;;  %v756_v32 = vpop.xlane.xlu0 %755 }
 0x1d5   : > { %v773_v33 = vadd.f32 %v761_v31, %v733_v29  ;;  %v772_v34 = vadd.f32 %v756_v32, %v732_v30 }
 0x1d7   : > { %777 = vst.msk [vmem:[%s1566_s4 + $0x8] sm:$0xff] %vm727_vm2, %v773_v33  ;;  %776 = vst.msk [vmem:[%s1566_s4] sm:$0xff] %vm727_vm2, %v772_v34  ;;  %796 = sbr.rel (!%p1140_p6) target bundleno = 476 (0x1dc), region = 59 }
 0x1d8   : > { %v771_v37 = vpop.xlane.xlu1 %770  ;;  %v766_v38 = vpop.xlane.xlu0 %765 }
 0x1d9   : > { %v775_v39 = vadd.f32 %v771_v37, %v735_v35  ;;  %v774_v40 = vadd.f32 %v766_v38, %v734_v36 }
 0x1db   : > { %779 = vst.msk [vmem:[%s1566_s4 + $0x18] sm:$0xff] %vm727_vm2, %v775_v39  ;;  %778 = vst.msk [vmem:[%s1566_s4 + $0x10] sm:$0xff] %vm727_vm2, %v774_v40 }
 0x1dc PF: > { %s15_s19 = sadd.s32 1, %s1077_s19   ;;  %s1568_s15 = smov %s1065_s16 }
 0x1dd   : > { %p12_p12 = scmp.ge.s32.totalorder %s15_s19, 4   ;;  %s1569_s16 = smov %s1145_s25 }
 0x1de   : > { %s1570_s17 = smov %s1073_s18  ;;  %s1571_s18 = smov %s1573_s20 }
 0x1df   :  { %14 = sbr.rel (!%p12_p12) target bundleno = 3 (0x3), region = 137 }

</bundles_post_ra>
